<compile_context>
chip_gen: v7x
topology: tpu7x:2x2x1
jax: 0.10.0
libtpu: 0.0.40
codegen_flags: <defaults>
</compile_context>

<pallas_src>
import functools

import jax
import jax.numpy as jnp
from jax.experimental import pallas as pl
from jax.experimental.pallas import tpu as pltpu


def _ce_label_smooth_kernel(
    logits_ref, targets_ref, out_ref, acc_ref, *,
    epsilon, num_classes, n_total, tile_n, tiles_per_core
):
    p = pl.program_id(0)          # partition / core index ("parallel")
    i = pl.program_id(1)          # tile index within the partition ("arbitrary")

    @pl.when(i == 0)
    def _():
        acc_ref[...] = jnp.zeros_like(acc_ref)

    x = logits_ref[...].astype(jnp.float32)            # (TILE_N, C)
    tgt = targets_ref[...]                             # (TILE_N, 1) int32

    # Stable per-row log-sum-exp: lse = m + log(sum exp(x - m)).
    m = jnp.max(x, axis=1, keepdims=True)              # (TILE_N, 1)
    lse = m + jnp.log(jnp.sum(jnp.exp(x - m), axis=1, keepdims=True))

    # Single weighted C-reduction replaces separate target-gather + row-sum:
    #   loss_row = -(1-eps)*logp[t] - (eps/C)*sum_c logp[c] = lse - sum_c w_c*x_c
    cls_ids = jax.lax.broadcasted_iota(jnp.int32, x.shape, 1)
    base_w = epsilon / num_classes
    w = jnp.where(cls_ids == tgt, 1.0 - epsilon + base_w, base_w)
    ws = jnp.sum(w * x, axis=1, keepdims=True)          # (TILE_N, 1)

    loss_row = lse - ws                                  # (TILE_N, 1)

    # Mask rows beyond the true batch size (tail padding / clamped OOB tiles).
    t = p * tiles_per_core + i
    row_ids = t * tile_n + jax.lax.broadcasted_iota(jnp.int32, loss_row.shape, 0)
    loss_row = jnp.where(row_ids < n_total, loss_row, 0.0)

    acc_ref[...] = acc_ref[...] + loss_row

    @pl.when(i == pl.num_programs(1) - 1)
    def _():
        out_ref[...] = jnp.sum(acc_ref[...]).reshape(1, 1, 1)


def _vmem_capacity_bytes():
    """Physical VMEM of the current TPU generation (conservative fallback)."""
    try:
        info = pltpu.get_tpu_info()
        cap = getattr(info, "vmem_capacity_bytes", None)
        if cap:
            return int(cap)
    except Exception:
        pass
    return 128 << 20  # v5e/v6e; v7x has 64 MiB (query above covers it)


def _choose_tile_n(n, c, itemsize, vmem_bytes):
    """Biggest row-tile whose pipelined VMEM footprint fits the budget."""
    c_pad = ((c + 127) // 128) * 128 or 128            # lane padding in VMEM
    # Per-row VMEM bytes: 2 double-buffered logits blocks + 2 double-buffered
    # (TILE_N,1) targets blocks + the (TILE_N,1) f32 accumulator scratch
    # (narrow blocks pad to 128 lanes).
    per_row = 2 * c_pad * itemsize + 3 * 128 * 4
    budget = max(2 << 20, int(vmem_bytes * 0.35))      # generation-aware budget
    per_buf_target = 8 << 20                           # ~8 MiB/block pipelining sweet spot
    rows = min(budget // per_row, per_buf_target // (c_pad * itemsize), 8192)
    rows = max(8, (rows // 8) * 8)                     # f32 sublane multiple
    n_pad = ((n + 7) // 8) * 8
    if n_pad <= rows:
        return n   # single tile == full array (always a legal block shape)
    return rows


def cross_entropy_label_smooth(inputs, targets, *, num_classes, epsilon,
                               tile_n=None, num_cores=2):
    """inputs: (N, C) f32/bf16 logits; targets: (N,) int labels -> scalar loss."""
    n, c = inputs.shape
    assert c == num_classes
    targets2d = targets.astype(jnp.int32).reshape(n, 1)

    vmem_bytes = _vmem_capacity_bytes()
    if tile_n is None:
        tile_n = _choose_tile_n(n, c, inputs.dtype.itemsize, vmem_bytes)
    elif tile_n != n and tile_n % 8 != 0:
        tile_n = ((tile_n + 7) // 8) * 8               # enforce (8,128) sublane rule
    tile_n = int(tile_n)

    num_tiles = int(pl.cdiv(n, tile_n))
    num_cores = max(1, min(int(num_cores), num_tiles))
    tiles_per_core = int(pl.cdiv(num_tiles, num_cores))

    def block_map(p, i):
        # Clamp so over-allocated tiles read a valid block; their rows are
        # masked out in the kernel via row_ids < N.
        return (jnp.minimum(p * tiles_per_core + i, num_tiles - 1), 0)

    kernel = functools.partial(
        _ce_label_smooth_kernel,
        epsilon=float(epsilon),
        num_classes=int(num_classes),
        n_total=int(n),
        tile_n=tile_n,
        tiles_per_core=tiles_per_core,
    )

    vmem_limit = min(int(vmem_bytes * 0.65), 100 << 20)

    partials = pl.pallas_call(
        kernel,
        out_shape=jax.ShapeDtypeStruct((num_cores, 1, 1), jnp.float32),
        grid=(num_cores, tiles_per_core),
        in_specs=[
            pl.BlockSpec((tile_n, c), block_map),      # logits tile
            pl.BlockSpec((tile_n, 1), block_map),      # co-tiled targets
        ],
        out_specs=pl.BlockSpec((1, 1, 1), lambda p, i: (p, 0, 0)),  # per-core partial
        scratch_shapes=[pltpu.VMEM((tile_n, 1), jnp.float32)],
        compiler_params=pltpu.CompilerParams(
            dimension_semantics=("parallel", "arbitrary"),
            vmem_limit_bytes=vmem_limit,
        ),
    )(inputs, targets2d)

    return jnp.sum(partials) / jnp.float32(n)


def _reference(inputs, targets, num_classes, epsilon):
    log_probs = jax.nn.log_softmax(inputs.astype(jnp.float32), axis=1)
    onehot = jax.nn.one_hot(targets, num_classes, dtype=jnp.float32)
    t = (1.0 - epsilon) * onehot + epsilon / num_classes
    return jnp.sum(jnp.mean(-t * log_probs, axis=0))


if __name__ == "__main__":
    num_classes = 16
    epsilon = 0.1
    batch = 12  # not a multiple of the tile -> exercises the tail mask

    key = jax.random.PRNGKey(0)
    k1, k2 = jax.random.split(key)
    logits = jax.random.normal(k1, (batch, num_classes), dtype=jnp.float32)
    labels = jax.random.randint(k2, (batch,), 0, num_classes, dtype=jnp.int32)

    ref = _reference(logits, labels, num_classes, epsilon)

    # Explicit small tile -> 2 tiles split across the 2-way leading axis;
    # exercises per-partition partial sums + tail-row masking.
    loss = cross_entropy_label_smooth(
        logits, labels, num_classes=num_classes, epsilon=epsilon, tile_n=8
    )
    loss = jax.block_until_ready(loss)
    assert jnp.allclose(loss, ref, atol=1e-5, rtol=1e-5), (loss, ref)

    # Auto-sized tile (single full-batch block).
    loss2 = cross_entropy_label_smooth(
        logits, labels, num_classes=num_classes, epsilon=epsilon
    )
    loss2 = jax.block_until_ready(loss2)
    assert jnp.allclose(loss2, ref, atol=1e-5, rtol=1e-5), (loss2, ref)

    # Tiny batch (< 8 rows): full-array block path.
    logits3, labels3 = logits[:2], labels[:2]
    ref3 = _reference(logits3, labels3, num_classes, epsilon)
    loss3 = cross_entropy_label_smooth(
        logits3, labels3, num_classes=num_classes, epsilon=epsilon
    )
    loss3 = jax.block_until_ready(loss3)
    assert jnp.allclose(loss3, ref3, atol=1e-5, rtol=1e-5), (loss3, ref3)

    print("KERNEL_OK")
</pallas_src>

<mosaic_0001>
module attributes {stable_mosaic.version = 11 : i64} {
  func.func @_ce_label_smooth_kernel(%arg0: i32, %arg1: i32, %arg2: memref<8x16xf32, #tpu.memory_space<vmem>>, %arg3: memref<8x1xi32, #tpu.memory_space<vmem>>, %arg4: memref<1x1x1xf32, #tpu.memory_space<vmem>>, %arg5: memref<8x1xf32, #tpu.memory_space<vmem>>) attributes {dimension_semantics = [#tpu.dimension_semantics<parallel>, #tpu.dimension_semantics<arbitrary>], iteration_bounds = array<i64: 2, 1>, scalar_prefetch = 0 : i64, scratch_operands = 1 : i64, tpu.core_type = #tpu.core_type<tc>, window_params = [{transform_indices = @transform_0, window_bounds = array<i64: 8, 16>}, {transform_indices = @transform_1, window_bounds = array<i64: 8, 1>}, {transform_indices = @transform_2, window_bounds = array<i64: 1, 1, 1>}]} {
    %c0_i32 = arith.constant 0 : i32
    %0 = arith.cmpi eq, %arg1, %c0_i32 : i32
    %1 = arith.extui %0 : i1 to i32
    %c0_i32_0 = arith.constant 0 : i32
    %2 = arith.cmpi ne, %1, %c0_i32_0 : i32
    scf.if %2 {
      %cst_15 = arith.constant 0.000000e+00 : f32
      %40 = vector.broadcast %cst_15 : f32 to vector<8x1xf32>
      %c0_16 = arith.constant 0 : index
      %c0_17 = arith.constant 0 : index
      %41 = vector.load %arg5[%c0_16, %c0_17] : memref<8x1xf32, #tpu.memory_space<vmem>>, vector<8x1xf32>
      tpu.vector_store %arg5[%c0_16, %c0_17], %40 {strides = array<i32>} : memref<8x1xf32, #tpu.memory_space<vmem>>, vector<8x1xf32>,
    } else {
    }
    %c0 = arith.constant 0 : index
    %c0_1 = arith.constant 0 : index
    %3 = vector.load %arg2[%c0, %c0_1] : memref<8x16xf32, #tpu.memory_space<vmem>>, vector<8x16xf32>
    %c0_2 = arith.constant 0 : index
    %c0_3 = arith.constant 0 : index
    %4 = vector.load %arg3[%c0_2, %c0_3] : memref<8x1xi32, #tpu.memory_space<vmem>>, vector<8x1xi32>
    %cst = arith.constant dense<0xFF800000> : vector<8xf32>
    %5 = vector.multi_reduction <maximumf>, %3, %cst [1] : vector<8x16xf32> to vector<8xf32>
    %6 = vector.shape_cast %5 : vector<8xf32> to vector<8x1xf32>
    %7 = vector.broadcast %6 : vector<8x1xf32> to vector<8x16xf32>
    %8 = arith.subf %3, %7 : vector<8x16xf32>
    %9 = math.exp %8 : vector<8x16xf32>
    %cst_4 = arith.constant dense<0.000000e+00> : vector<8xf32>
    %10 = vector.multi_reduction <add>, %9, %cst_4 [1] : vector<8x16xf32> to vector<8xf32>
    %11 = vector.shape_cast %10 : vector<8xf32> to vector<8x1xf32>
    %12 = math.log %11 : vector<8x1xf32>
    %13 = arith.addf %6, %12 : vector<8x1xf32>
    %14 = tpu.iota {dimensions = array<i32: 1>} : vector<8x16xi32>
    %15 = vector.broadcast %4 : vector<8x1xi32> to vector<8x16xi32>
    %16 = arith.cmpi eq, %14, %15 : vector<8x16xi32>
    %cst_5 = arith.constant 9.062500e-01 : f32
    %cst_6 = arith.constant 6.250000e-03 : f32
    %17 = vector.broadcast %cst_5 : f32 to vector<8x16xf32>
    %18 = vector.broadcast %cst_6 : f32 to vector<8x16xf32>
    %19 = arith.select %16, %17, %18 : vector<8x16xi1>, vector<8x16xf32>
    %20 = arith.mulf %19, %3 : vector<8x16xf32>
    %cst_7 = arith.constant dense<0.000000e+00> : vector<8xf32>
    %21 = vector.multi_reduction <add>, %20, %cst_7 [1] : vector<8x16xf32> to vector<8xf32>
    %22 = vector.shape_cast %21 : vector<8xf32> to vector<8x1xf32>
    %23 = arith.subf %13, %22 : vector<8x1xf32>
    %c1_i32 = arith.constant 1 : i32
    %24 = arith.muli %arg0, %c1_i32 : i32
    %25 = arith.addi %24, %arg1 : i32
    %c8_i32 = arith.constant 8 : i32
    %26 = arith.muli %25, %c8_i32 : i32
    %27 = tpu.iota {dimensions = array<i32: 0>} : vector<8x1xi32>
    %28 = vector.broadcast %26 : i32 to vector<8x1xi32>
    %29 = arith.addi %28, %27 : vector<8x1xi32>
    %c12_i32 = arith.constant 12 : i32
    %30 = vector.broadcast %c12_i32 : i32 to vector<8x1xi32>
    %31 = arith.cmpi slt, %29, %30 : vector<8x1xi32>
    %cst_8 = arith.constant 0.000000e+00 : f32
    %32 = vector.broadcast %cst_8 : f32 to vector<8x1xf32>
    %33 = arith.select %31, %23, %32 : vector<8x1xi1>, vector<8x1xf32>
    %c0_9 = arith.constant 0 : index
    %c0_10 = arith.constant 0 : index
    %34 = vector.load %arg5[%c0_9, %c0_10] : memref<8x1xf32, #tpu.memory_space<vmem>>, vector<8x1xf32>
    %35 = arith.addf %34, %33 : vector<8x1xf32>
    %c0_11 = arith.constant 0 : index
    %c0_12 = arith.constant 0 : index
    %36 = vector.load %arg5[%c0_11, %c0_12] : memref<8x1xf32, #tpu.memory_space<vmem>>, vector<8x1xf32>
    tpu.vector_store %arg5[%c0_11, %c0_12], %35 {strides = array<i32>} : memref<8x1xf32, #tpu.memory_space<vmem>>, vector<8x1xf32>,
    %c0_i32_13 = arith.constant 0 : i32
    %37 = arith.cmpi eq, %arg1, %c0_i32_13 : i32
    %38 = arith.extui %37 : i1 to i32
    %c0_i32_14 = arith.constant 0 : i32
    %39 = arith.cmpi ne, %38, %c0_i32_14 : i32
    scf.if %39 {
      %c0_15 = arith.constant 0 : index
      %c0_16 = arith.constant 0 : index
      %40 = vector.load %arg5[%c0_15, %c0_16] : memref<8x1xf32, #tpu.memory_space<vmem>>, vector<8x1xf32>
      %41 = vector.shape_cast %40 : vector<8x1xf32> to vector<1x8x1xf32>
      %cst_17 = arith.constant dense<0.000000e+00> : vector<1xf32>
      %42 = vector.multi_reduction <add>, %41, %cst_17 [1, 2] : vector<1x8x1xf32> to vector<1xf32>
      %43 = vector.shape_cast %42 : vector<1xf32> to vector<1x1x1xf32>
      %44 = vector.extract %43[0, 0, 0] : f32 from vector<1x1x1xf32>
      %45 = vector.broadcast %44 : f32 to vector<1x1x1xf32>
      %c0_18 = arith.constant 0 : index
      %c0_19 = arith.constant 0 : index
      %c0_20 = arith.constant 0 : index
      %46 = vector.load %arg4[%c0_18, %c0_19, %c0_20] : memref<1x1x1xf32, #tpu.memory_space<vmem>>, vector<1x1x1xf32>
      tpu.vector_store %arg4[%c0_18, %c0_19, %c0_20], %45 {strides = array<i32>} : memref<1x1x1xf32, #tpu.memory_space<vmem>>, vector<1x1x1xf32>,
    } else {
    }
    return
  }
  func.func @transform_0(%arg0: i32, %arg1: i32) -> (i32, i32) {
    %c1_i32 = arith.constant 1 : i32
    %0 = arith.muli %arg0, %c1_i32 : i32
    %1 = arith.addi %0, %arg1 : i32
    %c1_i32_0 = arith.constant 1 : i32
    %2 = arith.minsi %1, %c1_i32_0 : i32
    %c0_i32 = arith.constant 0 : i32
    %c0_i32_1 = arith.constant 0 : i32
    return %2, %c0_i32 : i32, i32
  }
  func.func @transform_1(%arg0: i32, %arg1: i32) -> (i32, i32) {
    %c1_i32 = arith.constant 1 : i32
    %0 = arith.muli %arg0, %c1_i32 : i32
    %1 = arith.addi %0, %arg1 : i32
    %c1_i32_0 = arith.constant 1 : i32
    %2 = arith.minsi %1, %c1_i32_0 : i32
    %c0_i32 = arith.constant 0 : i32
    %c0_i32_1 = arith.constant 0 : i32
    return %2, %c0_i32 : i32, i32
  }
  func.func @transform_2(%arg0: i32, %arg1: i32) -> (i32, i32, i32) {
    %c0_i32 = arith.constant 0 : i32
    %c0_i32_0 = arith.constant 0 : i32
    %c0_i32_1 = arith.constant 0 : i32
    return %arg0, %c0_i32, %c0_i32_0 : i32, i32, i32
  }
}

</mosaic_0001>

<bundles_post_ra>
// kernel: tpu_custom_call.1
= control target key start
LH: loop header
LB: loop body
LE: loop exit
PB: predicated region body
PF: predicated region fallthrough
CT: control target
= control target key end

     0   :  { %7 = vsyncpa [#allocation4], 0  ;;  %s970_s0 = inlined_call_operand.hbm [shape: f32[12,16], index: 0, kind: input, shape index: {}]   ;;  %s971_s1 = inlined_call_operand.hbm [shape: s32[12,1], index: 1, kind: input, shape index: {}]   ;;  %s972_s2 = inlined_call_operand.hbm [shape: f32[2,1,1], index: 2, kind: output, shape index: {}]  }
   0x1   :  { %9 = vsyncpa [#allocation4 + $0x1], 0 }
   0x2   :  { %10 = vsyncpa [#allocation7], 0 }
   0x3   :  { %12 = vsyncpa [#allocation7 + $0x1], 0 }
   0x4   :  { %13 = vsyncpa [#allocation5], 0 }
   0x5   :  { %15 = vsyncpa [#allocation5 + $0x1], 0  ;;  %s712_s9 = smov 0   ;;  %s714_s10 = smov 0  }
   0x6   :  { %s716_s11 = smov 0   ;;  %s718_s12 = smov 0  }
   0x7   :  { %s720_s13 = smov 0   ;;  %s722_s14 = smov 0  }
   0x8   :  { %s724_s15 = smov 0   ;;  %s726_s16 = smov 0  }
   0x9   :  { %s728_s17 = smov 0  }
   0xa LB: > { %s403_s18 = sadd.s32 4294967295, %s689_s17   ;;  %s404_s19 = sadd.s32 4294967294, %s689_s17   ;;  %s689_s17 = sphi %s728_s17, %s21_s17   ;;  %s685_s16 = sphi %s726_s16, %s997_s16   ;;  %s681_s15 = sphi %s724_s15, %s996_s15   ;;  %s677_s14 = sphi %s722_s14, %s995_s14   ;;  %s673_s13 = sphi %s720_s13, %s994_s13   ;;  %s669_s12 = sphi %s718_s12, %s993_s12   ;;  %s665_s11 = sphi %s716_s11, %s992_s11   ;;  %s661_s10 = sphi %s714_s10, %s991_s10   ;;  %s657_s9 = sphi %s712_s9, %s990_s9  }
   0xb   : > { %s33_s20 = sadd.s32 1, %s685_s16  ;;  %p38_p0 = scmp.lt.s32.totalorder %s685_s16, 1 }
   0xc   : > { %p35_p1 = scmp.ge.s32.totalorder %s33_s20, 2  ;;  %s46_s21 = sadd.s32 1, %s677_s14 }
   0xd   : > { %s761_s22 = scalar_select %p38_p0, %s685_s16, 1 }
   0xe   : > { %s999_s20 = smov (%p35_p1, %s33_s20), 0  ;;  %p53_p2 = scmp.ne.s32.totalorder %s677_s14, %s673_s13 }
   0xf   : > { %p54_p3 = scmp.eq.s32.totalorder %s689_s17, 0  ;;  %p41_p4 = scmp.lt.s32.totalorder %s999_s20, 1 }
  0x10   : > { %p59_p5 = scmp.ne.s32.totalorder %s673_s13, %s669_s12  ;;  %p60_p7 = scmp.eq.s32.totalorder %s403_s18, 0 }
  0x11   : > { %p770_p6 = por %p54_p3, %p53_p2  ;;  %s101_s26 = ssub.s32 %s685_s16, %s999_s20 }
  0x12   : > { %s42_s24 = scalar_select %p41_p4, %s999_s20, 1 }
  0x13   : > { %p775_p8 = por %p60_p7, %p59_p5  ;;  %p102_p9 = scmp.eq.s32.totalorder %s101_s26, 0 }
  0x14   : > { %s43_s27 = ssub.s32 %s761_s22, %s42_s24  ;;  %s104_s28 = sadd.s32 1, %s665_s11 }
  0x15   : > { %s977_s25 = scalar_select %p775_p8, 1, 0 }
  0x16   : > { %p44_p10 = scmp.eq.s32.totalorder %s43_s27, 0  ;;  %p114_p11 = scmp.ne.s32.totalorder %s665_s11, %s661_s10 }
  0x17   : > { %s784_s29 = scalar_select %p102_p9, %s665_s11, %s104_s28  }
  0x18   : > { %s787_s30 = scalar_select %p44_p10, %s677_s14, %s46_s21  }
  0x19   : > { %p115_p12 = scmp.eq.s32.totalorder %s403_s18, 1  ;;  %p120_p13 = scmp.ne.s32.totalorder %s661_s10, %s657_s9 }
  0x1a   : > { %p121_p0 = scmp.eq.s32.totalorder %s404_s19, 1  ;;  %p437_p4 = scmp.lt.s32.totalorder %s689_s17, 2 }
  0x1b   : > { %p793_p1 = por %p115_p12, %p114_p11  ;;  %s804_s5 = sand.u32 1, %s677_s14  }
  0x1c   : > { %p798_p3 = por %p121_p0, %p120_p13  ;;  %s408_s6 = sshll.u32 %s761_s22, 7 }
  0x1d   : > { %s978_s3 = scalar_select %p793_p1, 1, 0 }
  0x1e   : > { %s979_s4 = scalar_select %p798_p3, 1, 0 }
  0x1f   : > { %s973_s7 = sshll.u32 %s804_s5, 3  ;;  %s813_s18 = scalar_lea.hbm %s970_s0, %s408_s6 }
  0x20   : > { %s145_s19 = scalar_lea.vmem [#allocation3], %s973_s7  ;;  %p819_p5 = pnand %p437_p4, %p770_p6 }
  0x21   : > { %s155_s21 = sshll.u32 %s145_s19, 4  ;;  %s142_s26 = scalar_lea.sflag [#allocation4], %s804_s5  ;;  %s823_s21 = int_to_ptr.vmem [resolvable:$true] %s155_s21 }
  0x22   : > { %s519_s27 = scalar_lea.hbm %s813_s18, 128  ;;  %p521_p11 = pneg %p819_p5 }
  0x23   : > { %p520_p10 = scmp.ne.s32.totalorder %s813_s18, %s519_s27  ;;  %s524_s8 = scalar_lea.hbm %s970_s0, 256 }
  0x24   : > { %p525_p6 = scmp.lt.u32.totalorder %s813_s18, %s970_s0  ;;  %p526_p0 = scmp.lt.u32.totalorder %s524_s8, %s519_s27 }
  0x25   : > { %p522_p12 = pnand %p521_p11, %p520_p10  ;;  %p528_p2 = scmp.lt.u32.totalorder %s519_s27, %s813_s18 }
  0x26   : > { %p527_p4 = por %p526_p0, %p525_p6 }
  0x27   : > { %p523_p13 = pneg %p522_p12 }
  0x28   : > { %p529_p7 = por %p528_p2, %p527_p4 }
  0x2a   : > { %p530_p9 = pnand %p529_p7, %p523_p13 }
  0x2c   : > { %533 = shalt.err (!%p530_p9)
}
  0x2d   : > { %s534_s7 = scalar_lea.vmem %s823_s21, 128  ;;  %s691_s23 = smov [#allocation3]  }
  0x2e   : > { %p535_p10 = scmp.ne.s32.totalorder %s823_s21, %s534_s7  ;;  %s539_s28 = sshll.u32 %s691_s23, 4  ;;  %s540_s28 = int_to_ptr.vmem [resolvable:$false] %s539_s28 }
  0x2f   : > { %s541_s12 = scalar_lea.vmem %s540_s28, 256  ;;  %p542_p1 = scmp.lt.s32.totalorder %s823_s21, %s540_s28 }
  0x30   : > { %p537_p12 = pnand %p535_p10, %p521_p11  ;;  %p543_p6 = scmp.lt.s32.totalorder %s541_s12, %s534_s7 }
  0x32   : > { %p538_p3 = pneg %p537_p12  ;;  %p544_p0 = por %p543_p6, %p542_p1 }
  0x34   : > { %p545_p2 = pnand %p544_p0, %p538_p3 }
  0x36   : > { %548 = shalt.err (!%p545_p2)
}
  0x37   : > { %429 = dma.hbm_to_vmem [thread:$0]  (!%p819_p5), %s813_s18, 128, %s823_s21, %s142_s26  }
  0x38   : > { %p981_p7 = scmp.lt.s32.totalorder %s689_s17, 3  ;;  %p982_p9 = scmp.ge.s32.totalorder %s689_s17, 1 }
  0x39   : > { %s866_s19 = scalar_lea.hbm %s971_s1, %s408_s6  ;;  %s984_s23 = sshll.u32 %s804_s5, 3 }
  0x3a   : > { %p857_p13 = pnand %p982_p9, %p981_p7  ;;  %s166_s28 = scalar_lea.vmem [#allocation6], %s984_s23 }
  0x3b   : > { %s176_s12 = sshll.u32 %s166_s28, 4  ;;  %s163_s18 = scalar_lea.sflag [#allocation7], %s804_s5  ;;  %s177_s12 = int_to_ptr.vmem [resolvable:$true] %s176_s12 }
  0x3c   : > { %s983_s27 = scalar_select %p857_p13, 1, 0 }
  0x3d   : > { %s549_s21 = scalar_lea.hbm %s866_s19, 128  ;;  %s554_s6 = scalar_lea.hbm %s971_s1, 256 }
  0x3e   : > { %p550_p1 = scmp.ne.s32.totalorder %s866_s19, %s549_s21  ;;  %p555_p10 = scmp.lt.u32.totalorder %s866_s19, %s971_s1 }
  0x3f   : > { %p556_p12 = scmp.lt.u32.totalorder %s554_s6, %s549_s21  ;;  %p558_p0 = scmp.lt.u32.totalorder %s549_s21, %s866_s19 }
  0x40   : > { %p552_p3 = pnand %p550_p1, %p521_p11 }
  0x41   : > { %p557_p6 = por %p556_p12, %p555_p10 }
  0x42   : > { %p553_p4 = pneg %p552_p3 }
  0x43   : > { %p559_p2 = por %p558_p0, %p557_p6 }
  0x45   : > { %p560_p7 = pnand %p559_p2, %p553_p4 }
  0x47   : > { %563 = shalt.err (!%p560_p7)
}
  0x48   : > { %s564_s5 = scalar_lea.vmem %s177_s12, 128  ;;  %s692_s23 = smov [#allocation6]  }
  0x49   : > { %p565_p9 = scmp.ne.s32.totalorder %s177_s12, %s564_s5  ;;  %s569_s28 = sshll.u32 %s692_s23, 4  ;;  %s570_s28 = int_to_ptr.vmem [resolvable:$false] %s569_s28 }
  0x4a   : > { %s571_s22 = scalar_lea.vmem %s570_s28, 256  ;;  %p572_p8 = scmp.lt.s32.totalorder %s177_s12, %s570_s28 }
  0x4b   : > { %p567_p1 = pnand %p565_p9, %p521_p11  ;;  %p573_p13 = scmp.lt.s32.totalorder %s571_s22, %s564_s5 }
  0x4d   : > { %p568_p3 = pneg %p567_p1  ;;  %p574_p10 = por %p573_p13, %p572_p8 }
  0x4f   : > { %p575_p12 = pnand %p574_p10, %p568_p3 }
  0x51   : > { %578 = shalt.err (!%p575_p12)
}
  0x52   : > { %432 = dma.hbm_to_vmem [thread:$0]  (!%p819_p5), %s866_s19, 128, %s177_s12, %s163_s18  }
  0x53   : > { %p985_p4 = scmp.ne.s32.totalorder %s983_s27, 0 }
  0x54   : > { %s187_s21 = sand.u32 (!%p985_p4), 1, %s673_s13   ;;  %p986_p11 = scmp.ne.s32.totalorder (!%p985_p4), %s977_s25, 0 }
  0x55   : > { %185 = sbr.rel (%p985_p4) target bundleno = 645 (0x285), region = 28  ;;  %s412_s26 = sshll.u32 (!%p985_p4), %s187_s21, 3 }
  0x56   : > { %s188_s6 = scalar_lea.sflag (!%p985_p4), [#allocation4], %s187_s21  ;;  %s191_s7 = scalar_lea.vmem (!%p985_p4), [#allocation3], %s412_s26 }
  0x5c   : > { %644 = dma.done.wait (%p986_p11), %s188_s6, 128  }
  0x5d   : > { %646 = vsyncadd (%p986_p11), %s188_s6, 4294967168  ;;  %s197_s8 = scalar_lea.sflag [#allocation7], %s187_s21  ;;  %s200_s5 = scalar_lea.vmem [#allocation6], %s412_s26 }
  0x5e   : > { %648 = dma.done.wait (%p986_p11), %s197_s8, 128  }
  0x5f   : > { %650 = vsyncadd (%p986_p11), %s197_s8, 4294967168  ;;  %v693_v0 = vmov 0   ;;  %vm239_vm0 = vcmask 130048   ;;  %v237_v1 = vld [vmem:[%s191_s7] sm:$0xff]  ;;  %v238_v3 = vld [vmem:[%s200_s5] sm:$0xff]  ;;  %v252_v6 = vlaneseq  ;;  %vm235_vm2 = vcmask 7168  }
  0x60   : > { %514 = vset.pattern.permute.xlu0 %v693_v0  ;;  %v240_v2 = vsel %vm239_vm0, %v237_v1, -inf  ;;  %v694_v10 = vmov 0.00625   ;;  %v695_v16 = vmov 0.0   ;;  %s414_s25 = sshll.u32 %s681_s15, 3  ;;  %s223_s24 = sand.u32 1, %s661_s10  }
  0x61   : > { %241 = vmax.xlane.f32.xlu0 %v240_v2  ;;  %v253_v8 = vand.u32 127, %v252_v6  ;;  %236 = vst.msk [vmem:[#allocation2] sm:$0xff] %vm235_vm2, %v695_v16  ;;  %v267_v18 = vshrl.u32 %v252_v6, 7  ;;  %v268_v19 = vstv %s414_s25  ;;  %s415_s27 = sshll.u32 %s681_s15, 4  ;;  %s224_s19 = scalar_lea.vmem [#allocation8], %s223_s24  ;;  %vm291_vm4 = vcmask 0  }
  0x62   : > { %s306_s12 = sshll.u32 %s224_s19, 4  ;;  %s913_s28 = scalar_lea.hbm %s972_s2, %s415_s27  ;;  %s915_s12 = int_to_ptr.vmem [resolvable:$true] %s306_s12 }
  0x63   : > { %v269_v21 = vadd.s32 %v268_v19, %v267_v18  ;;  %s294_s21 = scalar_lea.sflag [#allocation5], %s223_s24  ;;  %s579_s26 = scalar_lea.vmem %s915_s12, 16 }
  0x64   : > { %p580_p8 = scmp.ne.s32.totalorder %s915_s12, %s579_s26  ;;  %p987_p5 = scmp.ne.s32.totalorder %s978_s3, 0 }
  0x65   : > { %vm270_vm3 = vcmp.lt.s32.totalorder %v269_v21, 12  ;;  %s696_s15 = smov [#allocation8]  }
  0x66   : > { %p581_p13 = pnand %p580_p8, %p987_p5  ;;  %s583_s6 = sshll.u32 %s696_s15, 4  ;;  %s584_s6 = int_to_ptr.vmem [resolvable:$false] %s583_s6 }
  0x67   : > { %s585_s7 = scalar_lea.vmem %s584_s6, 32  ;;  %p586_p0 = scmp.lt.s32.totalorder %s915_s12, %s584_s6 }
  0x68   : > { %v272_v26 = vld [vmem:[#allocation2] sm:$0xff]  ;;  %p582_p6 = pneg %p581_p13  ;;  %p587_p2 = scmp.lt.s32.totalorder %s585_s7, %s579_s26 }
  0x6a   : > { %p588_p7 = por %p587_p2, %p586_p0 }
  0x6c   : > { %p589_p9 = pnand %p588_p7, %p582_p6 }
  0x77   : > { %255 = vperm.xlu0 %514, %v238_v3  }
  0xee   : > { %v242_v4 = vpop.xlane.xlu0 %241 }
  0xef   : > { %v243_v5 = vsub.f32 %v237_v1, %v242_v4 }
  0xf1   : > { %v244_v7 = vmul.f32 1.442695, %v243_v5 }
  0xf3   : > { %515 = vpow2.f32 %v244_v7 }
  0xf6   : > { %v256_v9 = vpop.permute.xlu0 %255 }
  0xf7   : > { %vm257_vm1 = vcmp.eq.s32.totalorder %v253_v8, %v256_v9 }
  0xf8   : > { %v258_v11 = vsel %vm257_vm1, 0.90625, %v694_v10 }
  0xf9   : > { %v259_v12 = vmul.f32 %v258_v11, %v237_v1 }
  0xfb   : > { %v260_v15 = vsel %vm239_vm0, %v259_v12, 0.0 }
  0xfd   : > { %v516_v13 = vpop.eup %515 }
  0xfe   : > { %v246_v14 = vsel %vm239_vm0, %v516_v13, 0.0 }
  0xff   : > { %247 = vadd.xlane.f32.xlu1 %v246_v14 }
 0x103   : > { %261 = vadd.xlane.f32.xlu1 %v260_v15 }
 0x18c   : > { %v248_v17 = vpop.xlane.xlu1 %247 }
 0x18d   : > { %517 = vlog2.f32 %v248_v17 }
 0x190   : > { %v262_v23 = vpop.xlane.xlu1 %261 }
 0x197   : > { %v518_v20 = vpop.eup %517 }
 0x198   : > { %v250_v22 = vmul.f32 0.6931472, %v518_v20 }
 0x19a   : > { %v251_v24 = vadd.f32 %v250_v22, %v242_v4 }
 0x19c   : > { %v263_v25 = vsub.f32 %v251_v24, %v262_v23 }
 0x19e   : > { %v271_v27 = vsel %vm270_vm3, %v263_v25, 0.0 }
 0x19f   : > { %v273_v28 = vadd.f32 %v272_v26, %v271_v27 }
 0x1a1   : > { %275 = vst.msk [vmem:[#allocation2] sm:$0xff] %vm235_vm2, %v273_v28 }
 0x1a8   : > { %v279_v29 = vld [vmem:[#allocation2] sm:$0xff] }
 0x1a9   : > { %v280_v30 = vsel %vm235_vm2, %v279_v29, 0.0 }
 0x1aa   : > { %281 = vadd.xlane.f32.xlu1 %v280_v30 }
 0x237   : > { %v282_v31 = vpop.xlane.xlu1 %281 }
 0x238   : > { %v283_v32 = vrot.slane %v282_v31, 4 }
 0x23a   : > { %v284_v33 = vadd.f32 %v283_v32, %v282_v31 }
 0x23c   : > { %v285_v34 = vrot.slane %v284_v33, 2 }
 0x23e   : > { %v286_v35 = vadd.f32 %v285_v34, %v284_v33 }
 0x240   : > { %v287_v36 = vrot.slane %v286_v35, 1 }
 0x242   : > { %v288_v37 = vadd.f32 %v287_v36, %v286_v35 }
 0x244   : > { %418 = vpush %v288_v37 }
 0x275   : > { %s419_s22 = spop %418 }
 0x276   : > { %v290_v38 = vstv %s419_s22 }
 0x277   : > { %292 = vst.msk [vmem:[%s224_s19] sm:$0x1] %vm291_vm4, %v290_v38 }
 0x278   : > { %592 = shalt.err (!%p589_p9)
}
 0x279   : > { %s593_s8 = scalar_lea.hbm %s913_s28, 16  ;;  %s597_s24 = scalar_lea.hbm %s972_s2, 32 }
 0x27a   : > { %p594_p1 = scmp.ne.s32.totalorder %s913_s28, %s593_s8  ;;  %p598_p12 = scmp.lt.u32.totalorder %s913_s28, %s972_s2 }
 0x27b   : > { %p599_p4 = scmp.lt.u32.totalorder %s597_s24, %s593_s8  ;;  %p601_p8 = scmp.lt.u32.totalorder %s593_s8, %s913_s28 }
 0x27c   : > { %p595_p3 = pnand %p594_p1, %p987_p5 }
 0x27d   : > { %p600_p11 = por %p599_p4, %p598_p12 }
 0x27e   : > { %p596_p10 = pneg %p595_p3 }
 0x27f   : > { %p602_p13 = por %p601_p8, %p600_p11 }
 0x281   : > { %p603_p6 = pnand %p602_p13, %p596_p10 }
 0x283   : > { %606 = shalt.err (!%p603_p6)
}
 0x284   : > { %424 = dma.vmem_to_hbm [thread:$0]  (%p987_p5), %s915_s12, 16, %s913_s28, %s294_s21  }
 0x285 PF: > { %s318_s18 = sand.u32 1, %s657_s9   ;;  %p988_p0 = scmp.ne.s32.totalorder %s979_s4, 0 }
 0x286   : > { %p989_p2 = scmp.ge.s32.totalorder %s689_s17, 2  ;;  %s319_s23 = scalar_lea.sflag [#allocation5], %s318_s18 }
 0x288   : > { %p434_p7 = pnand %p989_p2, %p988_p0 }
 0x28a   : > { %652 = dma.done.wait (!%p434_p7), %s319_s23, 16  }
 0x28b   : > { %654 = vsyncadd (!%p434_p7), %s319_s23, 4294967280  ;;  %s21_s17 = sadd.s32 1, %s689_s17   ;;  %s990_s9 = smov %s661_s10 }
 0x28c   : > { %p18_p9 = scmp.ge.s32.totalorder %s21_s17, 4   ;;  %s991_s10 = smov %s665_s11 }
 0x28d   : > { %s992_s11 = smov %s784_s29  ;;  %s993_s12 = smov %s673_s13 }
 0x28e   : > { %s994_s13 = smov %s677_s14  ;;  %s995_s14 = smov %s787_s30 }
 0x28f   : > { %s996_s15 = smov %s685_s16  ;;  %s997_s16 = smov %s999_s20 }
 0x290   :  { %20 = sbr.rel (!%p18_p9) target bundleno = 10 (0xa), region = 94 }
 0x297   :  { %323 = vsyncpa [#allocation4], 1 }
 0x298   :  { %325 = vsyncpa [#allocation4 + $0x1], 1 }
 0x299   :  { %326 = vsyncpa [#allocation7], 1 }
 0x29a   :  { %328 = vsyncpa [#allocation7 + $0x1], 1 }
 0x29b   :  { %329 = vsyncpa [#allocation5], 1 }
 0x29c   :  { %331 = vsyncpa [#allocation5 + $0x1], 1 }

</bundles_post_ra>
